<compile_context>
chip_gen: v7x
topology: tpu7x:2x2x1
jax: 0.10.0
libtpu: 0.0.40
codegen_flags: <defaults>
</compile_context>

<pallas_src>
from functools import partial

import jax
import jax.numpy as jnp
from jax import lax
from jax.experimental import pallas as pl
from jax.experimental.pallas import tpu as pltpu

_LANE = 128
_SUBLANE = 8
_OUT_PAD = 512                      # a (tm, 1) f32 block pads to 512 B per row
_ACC_PAD = 512                      # per-row bytes of a 128-lane f32 accumulator

_DEFAULT_VMEM_BUDGET = 24 * 1024 * 1024   # total resident footprint target
_DEFAULT_TK_ROW_BYTES = 16 * 1024         # HW-tile bytes per row (dtype-aware)


def _round_up(x, m):
    return (x + m - 1) // m * m


def _round_down(x, m):
    return x // m * m


def _per_lane_partial(x_ref, k, *, hw, tk, grid_k, need_mask):
    """Per-lane f32 partial sums of one HW tile.

    Folds the TK lanes into a single 128-lane vector with plain VPU adds on
    128-lane chunks loaded straight from the ref (lane-aligned static slices,
    no block-sized f32 temporaries).  The cross-lane (XLU) reduce is deferred
    to the k == last finalize step.  Only chunks that can actually be ragged
    (in the trailing HW tile) pay for the lane mask.
    """
    lead = (slice(None),) * (len(x_ref.shape) - 1)
    s = None
    for j in range(tk // _LANE):
        xj = x_ref[lead + (slice(j * _LANE, (j + 1) * _LANE),)].astype(jnp.float32)
        if need_mask and ((grid_k - 1) * tk + (j + 1) * _LANE > hw):
            col = (k * tk + j * _LANE
                   + lax.broadcasted_iota(jnp.int32, xj.shape, xj.ndim - 1))
            xj = jnp.where(col < hw, xj, 0.0)
        s = xj if s is None else s + xj
    return s


def _gap_rows_kernel(x_ref, o_ref, *acc, inv_hw, hw, tk, grid_k, need_mask):
    """Row layout: x_ref (TM, TK), o_ref (TM, 1), acc (TM, 128) f32."""
    k = pl.program_id(1)

    if grid_k == 1:
        # Single reduction step: reduce + scale + cast directly, no accumulator.
        x = x_ref[...].astype(jnp.float32)
        o_ref[...] = (jnp.sum(x, axis=1, keepdims=True) * inv_hw).astype(o_ref.dtype)
        return

    (acc_ref,) = acc

    @pl.when(k == 0)
    def _init():
        acc_ref[...] = jnp.zeros_like(acc_ref)

    acc_ref[...] += _per_lane_partial(x_ref, k, hw=hw, tk=tk, grid_k=grid_k,
                                      need_mask=need_mask)

    @pl.when(k == pl.num_programs(1) - 1)
    def _finalize():
        # Exact mean semantics: scale by true 1/(H*W), then cast to out dtype.
        o_ref[...] = (jnp.sum(acc_ref[...], axis=1, keepdims=True)
                      * inv_hw).astype(o_ref.dtype)


def _gap_lanes_kernel(x_ref, o_ref, *acc, inv_hw, hw, tk, grid_k, need_mask):
    """Lane-dense layout: x_ref (TMO, 128, TK), o_ref (TMO, 128),
    acc (TMO, 128, 128) f32."""
    k = pl.program_id(1)

    if grid_k == 1:
        x = x_ref[...].astype(jnp.float32)
        o_ref[...] = (jnp.sum(x, axis=-1) * inv_hw).astype(o_ref.dtype)
        return

    (acc_ref,) = acc

    @pl.when(k == 0)
    def _init():
        acc_ref[...] = jnp.zeros_like(acc_ref)

    acc_ref[...] += _per_lane_partial(x_ref, k, hw=hw, tk=tk, grid_k=grid_k,
                                      need_mask=need_mask)

    @pl.when(k == pl.num_programs(1) - 1)
    def _finalize():
        o_ref[...] = (jnp.sum(acc_ref[...], axis=-1) * inv_hw).astype(o_ref.dtype)


def _pick_tk(hw, itemsize, tk_row_bytes, budget_bytes, min_rows, fixed_per_row):
    """HW (reduction) tile: full HW if it fits the per-row byte cap and the
    minimum-row-granule VMEM budget, else the largest lane-aligned chunk that
    does.  Equal bytes per block across dtypes."""
    per_lane = 2 * itemsize + 4          # double-buffered input + f32 temp, per row
    cap_rowbytes = max(tk_row_bytes // itemsize, _LANE)
    cap_budget = ((budget_bytes - min_rows * fixed_per_row)
                  // max(min_rows * per_lane, 1))
    tk_cap = max(_LANE, _round_down(min(cap_rowbytes, cap_budget), _LANE))
    return hw if hw <= tk_cap else tk_cap


def global_avg_pool2d(x, *, vmem_budget_bytes=_DEFAULT_VMEM_BUDGET,
                      tk_row_bytes=_DEFAULT_TK_ROW_BYTES):
    """x: (N, C, H, W) -> (N, C), mean over H*W (PyTorch GlobalAvgPool2d)."""
    n, c, h, w = x.shape
    rows = n * c
    hw = h * w
    itemsize = jnp.dtype(x.dtype).itemsize
    inv_hw = 1.0 / hw                    # exact-mean scaling by the true H*W

    vmem_limit = max(32 * 1024 * 1024, vmem_budget_bytes + 16 * 1024 * 1024)
    cparams = pltpu.CompilerParams(
        dimension_semantics=("parallel", "arbitrary"),   # rows over megacore,
        vmem_limit_bytes=vmem_limit,                     # HW is the reduction
    )

    if rows % _LANE == 0:
        # Lane-dense path: (rows/128, 128, HW) input, (rows/128, 128) output.
        rows_o = rows // _LANE
        min_rows = min(rows, _SUBLANE * _LANE)
        tk = _pick_tk(hw, itemsize, tk_row_bytes, vmem_budget_bytes,
                      min_rows, _ACC_PAD + 2 * 4)
        grid_k = pl.cdiv(hw, tk)
        need_mask = (hw % tk) != 0
        tk_lanes = _round_up(tk, _LANE)

        group_bytes = (_LANE * (2 * tk_lanes * itemsize + 4 * tk_lanes)
                       + 2 * _LANE * 4)
        if grid_k > 1:
            group_bytes += _LANE * _LANE * 4           # deferred per-lane acc
        budget_tmo = vmem_budget_bytes // group_bytes
        if budget_tmo >= rows_o:
            if rows_o >= 2 * _SUBLANE:                 # keep grid_m >= 2 (megacore)
                tmo = min(rows_o, _round_up(pl.cdiv(rows_o, 2), _SUBLANE))
            else:
                tmo = rows_o
        else:
            tmo = min(rows_o, max(_SUBLANE, _round_down(budget_tmo, _SUBLANE)))
        grid_m = pl.cdiv(rows_o, tmo)

        kernel = partial(_gap_lanes_kernel, inv_hw=inv_hw, hw=hw, tk=tk,
                         grid_k=grid_k, need_mask=need_mask)
        scratch = ([pltpu.VMEM((tmo, _LANE, _LANE), jnp.float32)]
                   if grid_k > 1 else [])
        out = pl.pallas_call(
            kernel,
            out_shape=jax.ShapeDtypeStruct((rows_o, _LANE), x.dtype),
            grid_spec=pltpu.PrefetchScalarGridSpec(
                num_scalar_prefetch=0,
                grid=(grid_m, grid_k),
                in_specs=[pl.BlockSpec((tmo, _LANE, tk), lambda i, k: (i, 0, k))],
                out_specs=pl.BlockSpec((tmo, _LANE), lambda i, k: (i, 0)),
                scratch_shapes=scratch,
            ),
            compiler_params=cparams,
        )(x.reshape(rows_o, _LANE, hw))
        return out.reshape(n, c)

    # Fallback row layout: (rows, HW) with a (rows, 1) output.  The padded
    # lane-1 output / accumulator blocks (512 B/row each) are charged to the
    # tile budget so they cannot silently eat VMEM once tm is large.
    # TODO(synk): rows not divisible by 128 could also be made lane-dense by
    # padding rows in HBM, but that copy would cost more HBM traffic than the
    # masked (tm, 1) writeback saves.
    row_mult = max(_SUBLANE, 32 // itemsize)           # 8 f32 / 16 bf16 / 32 int8
    min_rows = min(rows, row_mult)
    tk = _pick_tk(hw, itemsize, tk_row_bytes, vmem_budget_bytes,
                  min_rows, _ACC_PAD + 2 * _OUT_PAD)
    grid_k = pl.cdiv(hw, tk)
    need_mask = (hw % tk) != 0
    tk_lanes = _round_up(tk, _LANE)

    row_bytes = 2 * tk_lanes * itemsize + 4 * tk_lanes + 2 * _OUT_PAD
    if grid_k > 1:
        row_bytes += _ACC_PAD
    budget_tm = vmem_budget_bytes // row_bytes
    if budget_tm >= rows:
        if rows >= 2 * row_mult:                       # keep grid_m >= 2 (megacore)
            tm = min(rows, _round_up(pl.cdiv(rows, 2), row_mult))
        else:
            tm = rows
    else:
        tm = min(rows, max(row_mult, _round_down(budget_tm, row_mult)))
    grid_m = pl.cdiv(rows, tm)

    kernel = partial(_gap_rows_kernel, inv_hw=inv_hw, hw=hw, tk=tk,
                     grid_k=grid_k, need_mask=need_mask)
    scratch = [pltpu.VMEM((tm, _LANE), jnp.float32)] if grid_k > 1 else []
    out = pl.pallas_call(
        kernel,
        out_shape=jax.ShapeDtypeStruct((rows, 1), x.dtype),
        grid_spec=pltpu.PrefetchScalarGridSpec(
            num_scalar_prefetch=0,
            grid=(grid_m, grid_k),
            in_specs=[pl.BlockSpec((tm, tk), lambda i, k: (i, k))],
            out_specs=pl.BlockSpec((tm, 1), lambda i, k: (i, 0)),
            scratch_shapes=scratch,
        ),
        compiler_params=cparams,
    )(x.reshape(rows, hw))
    return out.reshape(n, c)


if __name__ == "__main__":
    key = jax.random.PRNGKey(0)

    # Primary case: small NCHW feature map consistent with the module.
    N, C, H, W = 2, 4, 16, 16
    x = jax.random.normal(key, (N, C, H, W), dtype=jnp.float32)
    out = jax.block_until_ready(global_avg_pool2d(x))
    ref = jnp.mean(x.reshape(N, C, -1), axis=2)
    assert out.shape == (N, C)
    assert jnp.allclose(out, ref, atol=1e-5, rtol=1e-5)

    # Ragged HW + multi-step reduction + partial row tile (tiny forced tiles).
    x2 = jax.random.normal(jax.random.PRNGKey(1), (2, 5, 13, 11), jnp.float32)
    out2 = jax.block_until_ready(
        global_avg_pool2d(x2, vmem_budget_bytes=4096, tk_row_bytes=512))
    assert jnp.allclose(out2, jnp.mean(x2.reshape(2, 5, -1), axis=2),
                        atol=1e-5, rtol=1e-5)

    # Lane-dense output path (rows % 128 == 0), single reduction step.
    x3 = jax.random.normal(jax.random.PRNGKey(2), (2, 64, 7, 7), jnp.float32)
    out3 = jax.block_until_ready(global_avg_pool2d(x3))
    assert out3.shape == (2, 64)
    assert jnp.allclose(out3, jnp.mean(x3.reshape(2, 64, -1), axis=2),
                        atol=1e-5, rtol=1e-5)

    # Lane-dense path with multiple row tiles (megacore row split).
    x4 = jax.random.normal(jax.random.PRNGKey(3), (8, 256, 7, 7), jnp.float32)
    out4 = jax.block_until_ready(global_avg_pool2d(x4))
    assert jnp.allclose(out4, jnp.mean(x4.reshape(8, 256, -1), axis=2),
                        atol=1e-5, rtol=1e-5)

    # Lane-dense path with ragged HW + multi-step reduction (forced tiles).
    x5 = jax.random.normal(jax.random.PRNGKey(4), (2, 128, 20, 10), jnp.float32)
    out5 = jax.block_until_ready(
        global_avg_pool2d(x5, vmem_budget_bytes=200_000, tk_row_bytes=512))
    assert jnp.allclose(out5, jnp.mean(x5.reshape(2, 128, -1), axis=2),
                        atol=1e-5, rtol=1e-5)

    # bf16 input: dtype-aware tiling, f32 accumulation, cast back to bf16.
    x6 = jax.random.normal(jax.random.PRNGKey(5), (2, 8, 16, 16), jnp.bfloat16)
    out6 = jax.block_until_ready(global_avg_pool2d(x6))
    ref6 = jnp.mean(x6.astype(jnp.float32).reshape(2, 8, -1), axis=2)
    assert jnp.allclose(out6.astype(jnp.float32), ref6, atol=5e-3, rtol=5e-2)

    print("KERNEL_OK")
</pallas_src>

<mosaic_0001>
module attributes {stable_mosaic.version = 11 : i64} {
  func.func @_gap_rows_kernel(%arg0: i32, %arg1: i32, %arg2: memref<8x256xf32, #tpu.memory_space<vmem>>, %arg3: memref<8x1xf32, #tpu.memory_space<vmem>>) attributes {dimension_semantics = [#tpu.dimension_semantics<parallel>, #tpu.dimension_semantics<arbitrary>], iteration_bounds = array<i64: 1, 1>, scalar_prefetch = 0 : i64, scratch_operands = 0 : i64, tpu.core_type = #tpu.core_type<tc>, window_params = [{transform_indices = @transform_0, window_bounds = array<i64: 8, 256>}, {transform_indices = @transform_1, window_bounds = array<i64: 8, 1>}]} {
    %c0 = arith.constant 0 : index
    %c0_0 = arith.constant 0 : index
    %0 = vector.load %arg2[%c0, %c0_0] : memref<8x256xf32, #tpu.memory_space<vmem>>, vector<8x256xf32>
    %cst = arith.constant dense<0.000000e+00> : vector<8xf32>
    %1 = vector.multi_reduction <add>, %0, %cst [1] : vector<8x256xf32> to vector<8xf32>
    %2 = vector.shape_cast %1 : vector<8xf32> to vector<8x1xf32>
    %cst_1 = arith.constant 3.906250e-03 : f32
    %3 = vector.broadcast %cst_1 : f32 to vector<8x1xf32>
    %4 = arith.mulf %2, %3 : vector<8x1xf32>
    %c0_2 = arith.constant 0 : index
    %c0_3 = arith.constant 0 : index
    %5 = vector.load %arg3[%c0_2, %c0_3] : memref<8x1xf32, #tpu.memory_space<vmem>>, vector<8x1xf32>
    tpu.vector_store %arg3[%c0_2, %c0_3], %4 {strides = array<i32>} : memref<8x1xf32, #tpu.memory_space<vmem>>, vector<8x1xf32>,
    return
  }
  func.func @transform_0(%arg0: i32, %arg1: i32) -> (i32, i32) {
    %c0_i32 = arith.constant 0 : i32
    return %arg0, %arg1 : i32, i32
  }
  func.func @transform_1(%arg0: i32, %arg1: i32) -> (i32, i32) {
    %c0_i32 = arith.constant 0 : i32
    %c0_i32_0 = arith.constant 0 : i32
    return %arg0, %c0_i32 : i32, i32
  }
}

</mosaic_0001>

<bundles_post_ra>
// kernel: tpu_custom_call.1
= control target key start
LH: loop header
LB: loop body
LE: loop exit
PB: predicated region body
PF: predicated region fallthrough
CT: control target
= control target key end

     0   :  { %6 = vsyncpa [#allocation3], 0  ;;  %s58_s6 = smov [#allocation2]   ;;  %s84_s0 = inlined_call_operand.hbm [shape: f32[8,256], index: 0, kind: input, shape index: {}]   ;;  %s85_s1 = inlined_call_operand.vmem [shape: f32[8,1], index: 1, kind: output, shape index: {}]  }
   0x1   :  { %s13_s7 = sshll.u32 %s58_s6, 4  ;;  %s34_s10 = scalar_lea.hbm %s84_s0, 256  ;;  %s14_s7 = int_to_ptr.vmem [resolvable:$true] %s13_s7 }
   0x2   :  { %p35_p0 = scmp.ne.s32.totalorder %s84_s0, %s34_s10  ;;  %p38_p1 = scmp.lt.u32.totalorder %s34_s10, %s84_s0 }
   0x4   :  { %p40_p2 = pnand %p38_p1, %p35_p0 }
   0x6   :  { %43 = shalt.err (!%p40_p2)
}
   0x7   :  { %s44_s15 = scalar_lea.vmem %s14_s7, 256  ;;  %p49_p4 = scmp.lt.s32.totalorder %s14_s7, %s14_s7 }
   0x8   :  { %p45_p3 = scmp.ne.s32.totalorder %s14_s7, %s44_s15  ;;  %p50_p5 = scmp.lt.s32.totalorder %s44_s15, %s44_s15 }
   0xa   :  { %p51_p6 = por %p50_p5, %p49_p4 }
   0xc   :  { %p52_p7 = pnand %p51_p6, %p45_p3 }
   0xe   :  { %55 = shalt.err (!%p52_p7)
}
   0xf   :  { %16 = dma.hbm_to_vmem [thread:$0]  %s84_s0, 256, %s14_s7, [#allocation3]  }
  0x10   :  { %56 = dma.done.wait [#allocation3], 256  }
  0x11   :  { %57 = vsyncadd [#allocation3], 4294967040  ;;  %v20_v0 = vld [vmem:[#allocation2] sm:$0xff]  ;;  %v21_v1 = vld [vmem:[#allocation2 + $0x8] sm:$0xff]  ;;  %vm26_vm0 = vcmask 7168  }
  0x12   :  { %v22_v2 = vadd.f32 %v21_v1, %v20_v0 }
  0x14   :  { %23 = vadd.xlane.f32.xlu0 %v22_v2 }
  0xa1   :  { %v24_v3 = vpop.xlane.xlu0 %23 }
  0xa2   :  { %v25_v4 = vmul.f32 0.00390625, %v24_v3 }
  0xa4   :  { %27 = vst.msk [vmem:[%s85_s1] sm:$0xff] %vm26_vm0, %v25_v4 }
  0xa5   :  { %32 = vsyncpa [#allocation3], 1 }

</bundles_post_ra>
